<compile_context>
chip_gen: v7x
topology: tpu7x:2x2x1
jax: 0.10.0
libtpu: 0.0.40
codegen_flags: <defaults>
</compile_context>

<pallas_src>
import functools

import jax
import jax.numpy as jnp
from jax import lax
from jax.experimental import pallas as pl
from jax.experimental.pallas import tpu as pltpu

_LANE = 128
_SUB = 8
_MAX_TILE_ROWS = 4096   # 4096 * 128 * 4B = 2 MiB per f32 input tile per pipeline buffer


def _bce_partial_kernel(ns_ref, pred_ref, gt_ref, out_ref, *, num_classes, tile_rows):
    t = pl.program_id(1)
    b = pl.program_id(0)

    @pl.when(t == 0)
    def _():
        out_ref[...] = jnp.zeros_like(out_ref)

    p = pred_ref[...].astype(jnp.float32)    # (1, tile_rows, 128)
    g = gt_ref[...].astype(jnp.float32)

    # Match PyTorch F.binary_cross_entropy: each log term is clamped at -100,
    # which also keeps 0 * (-inf) from producing NaN.
    log_p = jnp.maximum(jnp.log(p), -100.0)
    log_1mp = jnp.maximum(jnp.log(1.0 - p), -100.0)
    # -(g*log_p + (1-g)*log_1mp) == -(g*(log_p - log_1mp) + log_1mp)
    elem = -(g * (log_p - log_1mp) + log_1mp)

    # Valid elements are the first gt_ns[b] * num_classes flattened entries of
    # this batch. Compare the tile-local flat index against a scalar threshold
    # (no per-element integer division).
    tile_elems = tile_rows * _LANE
    thresh = ns_ref[b] * num_classes - t * tile_elems          # scalar int32
    row = lax.broadcasted_iota(jnp.int32, elem.shape, 1)
    lane = lax.broadcasted_iota(jnp.int32, elem.shape, 2)
    flat = row * _LANE + lane
    elem = jnp.where(flat < thresh, elem, 0.0)

    # (1, tile_rows, 128) -> (8, 128) partial sums: pure VPU vreg adds.
    part = elem.reshape(tile_rows // _SUB, _SUB, _LANE).sum(axis=0)
    out_ref[...] += part[None]


def classify_loss(pred_class, gt_class, gt_ns):
    """Pallas implementation of ClassifyLoss.forward.

    pred_class: (B, N, C) values in [0, 1] (any float dtype; cast in-kernel)
    gt_class:   (B, N, C) values in [0, 1]
    gt_ns:      (B,) int,  number of valid nodes per batch element
    returns:    scalar float32 = sum_b BCE_sum(pred[b, :ns[b]], gt[b, :ns[b]]) / sum_b ns[b]
    """
    B, N, C = pred_class.shape
    assert gt_class.shape == (B, N, C)
    gt_ns = gt_ns.astype(jnp.int32)
    # TODO(synk): the PyTorch module's value-range asserts (0 <= pred/gt <= 1) are not
    # reproduced; they are runtime data checks, not part of the computed loss.

    nc = N * C
    pad = (-nc) % (_SUB * _LANE)
    pred_f = pred_class.reshape(B, nc)
    gt_f = gt_class.reshape(B, nc)
    if pad:
        # Padded entries are masked out in-kernel; 0.5 keeps the logs finite.
        pred_f = jnp.pad(pred_f, ((0, 0), (0, pad)), constant_values=0.5)
        gt_f = jnp.pad(gt_f, ((0, 0), (0, pad)), constant_values=0.5)
    nr = (nc + pad) // _LANE                   # rows of 128 lanes, multiple of 8
    pred_f = pred_f.reshape(B, nr, _LANE)
    gt_f = gt_f.reshape(B, nr, _LANE)

    tile_rows = nr if nr <= _MAX_TILE_ROWS else _MAX_TILE_ROWS
    num_tiles = pl.cdiv(nr, tile_rows)

    kernel = functools.partial(
        _bce_partial_kernel, num_classes=C, tile_rows=tile_rows)

    partials = pl.pallas_call(
        kernel,
        out_shape=jax.ShapeDtypeStruct((B, _SUB, _LANE), jnp.float32),
        grid_spec=pltpu.PrefetchScalarGridSpec(
            num_scalar_prefetch=1,
            grid=(B, num_tiles),
            in_specs=[
                pl.BlockSpec((1, tile_rows, _LANE), lambda b, t, ns: (b, t, 0)),
                pl.BlockSpec((1, tile_rows, _LANE), lambda b, t, ns: (b, t, 0)),
            ],
            out_specs=pl.BlockSpec((1, _SUB, _LANE), lambda b, t, ns: (b, 0, 0)),
        ),
        compiler_params=pltpu.CompilerParams(
            dimension_semantics=("parallel", "arbitrary")),
    )(gt_ns, pred_f, gt_f)

    n_sum = jnp.sum(gt_ns).astype(jnp.float32)
    return (jnp.sum(partials) / n_sum).astype(jnp.float32)


def _reference(pred_class, gt_class, gt_ns):
    p = pred_class.astype(jnp.float32)
    g = gt_class.astype(jnp.float32)
    log_p = jnp.maximum(jnp.log(p), -100.0)
    log_1mp = jnp.maximum(jnp.log(1.0 - p), -100.0)
    elem = -(g * log_p + (1.0 - g) * log_1mp)          # (B, N, C)
    row_ids = jnp.arange(p.shape[1])[None, :, None]
    mask = row_ids < gt_ns[:, None, None]
    loss = jnp.sum(jnp.where(mask, elem, 0.0))
    return loss / jnp.sum(gt_ns).astype(jnp.float32)


if __name__ == "__main__":
    key = jax.random.PRNGKey(0)
    k1, k2 = jax.random.split(key)

    B, N, C = 2, 16, 8
    # Predictions in [0, 1] (as asserted by the PyTorch module).
    pred = jax.nn.sigmoid(jax.random.normal(k1, (B, N, C), dtype=jnp.float32))
    # Ground-truth "classes" in [0, 1] (binary targets).
    gt = (jax.random.uniform(k2, (B, N, C)) > 0.5).astype(jnp.float32)
    gt_ns = jnp.array([10, 16], dtype=jnp.int32)

    out = classify_loss(pred, gt, gt_ns)
    out = jax.block_until_ready(out)

    ref = _reference(pred, gt, gt_ns)
    assert jnp.allclose(out, ref, rtol=1e-5, atol=1e-5), (out, ref)

    print("KERNEL_OK")
</pallas_src>

<mosaic_0001>
module attributes {stable_mosaic.version = 11 : i64} {
  func.func @_bce_partial_kernel(%arg0: i32, %arg1: i32, %arg2: memref<2xi32, #tpu.memory_space<smem>>, %arg3: memref<1x8x128xf32, #tpu.memory_space<vmem>>, %arg4: memref<1x8x128xf32, #tpu.memory_space<vmem>>, %arg5: memref<1x8x128xf32, #tpu.memory_space<vmem>>) attributes {dimension_semantics = [#tpu.dimension_semantics<parallel>, #tpu.dimension_semantics<arbitrary>], iteration_bounds = array<i64: 2, 1>, scalar_prefetch = 1 : i64, scratch_operands = 0 : i64, tpu.core_type = #tpu.core_type<tc>, window_params = [{transform_indices = @transform_0, window_bounds = array<i64: 1, 8, 128>}, {transform_indices = @transform_1, window_bounds = array<i64: 1, 8, 128>}, {transform_indices = @transform_2, window_bounds = array<i64: 1, 8, 128>}]} {
    %c0_i32 = arith.constant 0 : i32
    %0 = arith.cmpi eq, %arg1, %c0_i32 : i32
    %1 = arith.extui %0 : i1 to i32
    %c0_i32_0 = arith.constant 0 : i32
    %2 = arith.cmpi ne, %1, %c0_i32_0 : i32
    scf.if %2 {
      %cst_17 = arith.constant 0.000000e+00 : f32
      %37 = vector.broadcast %cst_17 : f32 to vector<1x8x128xf32>
      %c0_18 = arith.constant 0 : index
      %c0_19 = arith.constant 0 : index
      %c0_20 = arith.constant 0 : index
      %38 = vector.load %arg5[%c0_18, %c0_19, %c0_20] : memref<1x8x128xf32, #tpu.memory_space<vmem>>, vector<1x8x128xf32>
      tpu.vector_store %arg5[%c0_18, %c0_19, %c0_20], %37 {strides = array<i32>} : memref<1x8x128xf32, #tpu.memory_space<vmem>>, vector<1x8x128xf32>,
    } else {
    }
    %c0 = arith.constant 0 : index
    %c0_1 = arith.constant 0 : index
    %c0_2 = arith.constant 0 : index
    %3 = vector.load %arg3[%c0, %c0_1, %c0_2] : memref<1x8x128xf32, #tpu.memory_space<vmem>>, vector<1x8x128xf32>
    %c0_3 = arith.constant 0 : index
    %c0_4 = arith.constant 0 : index
    %c0_5 = arith.constant 0 : index
    %4 = vector.load %arg4[%c0_3, %c0_4, %c0_5] : memref<1x8x128xf32, #tpu.memory_space<vmem>>, vector<1x8x128xf32>
    %5 = math.log %3 : vector<1x8x128xf32>
    %cst = arith.constant -1.000000e+02 : f32
    %6 = vector.broadcast %cst : f32 to vector<1x8x128xf32>
    %7 = arith.maximumf %5, %6 : vector<1x8x128xf32>
    %cst_6 = arith.constant 1.000000e+00 : f32
    %8 = vector.broadcast %cst_6 : f32 to vector<1x8x128xf32>
    %9 = arith.subf %8, %3 : vector<1x8x128xf32>
    %10 = math.log %9 : vector<1x8x128xf32>
    %cst_7 = arith.constant -1.000000e+02 : f32
    %11 = vector.broadcast %cst_7 : f32 to vector<1x8x128xf32>
    %12 = arith.maximumf %10, %11 : vector<1x8x128xf32>
    %13 = arith.subf %7, %12 : vector<1x8x128xf32>
    %14 = arith.mulf %4, %13 : vector<1x8x128xf32>
    %15 = arith.addf %14, %12 : vector<1x8x128xf32>
    %cst_8 = arith.constant 0.000000e+00 : f32
    %16 = vector.broadcast %cst_8 : f32 to vector<1x8x128xf32>
    %17 = arith.subf %16, %15 : vector<1x8x128xf32>
    %18 = arith.index_cast %arg0 : i32 to index
    %19 = memref.load %arg2[%18] : memref<2xi32, #tpu.memory_space<smem>>
    %c8_i32 = arith.constant 8 : i32
    %20 = arith.muli %19, %c8_i32 : i32
    %c1024_i32 = arith.constant 1024 : i32
    %21 = arith.muli %arg1, %c1024_i32 : i32
    %22 = arith.subi %20, %21 : i32
    %23 = tpu.iota {dimensions = array<i32: 1>} : vector<1x8x128xi32>
    %24 = tpu.iota {dimensions = array<i32: 2>} : vector<1x8x128xi32>
    %c128_i32 = arith.constant 128 : i32
    %25 = vector.broadcast %c128_i32 : i32 to vector<1x8x128xi32>
    %26 = arith.muli %23, %25 : vector<1x8x128xi32>
    %27 = arith.addi %26, %24 : vector<1x8x128xi32>
    %28 = vector.broadcast %22 : i32 to vector<1x8x128xi32>
    %29 = arith.cmpi slt, %27, %28 : vector<1x8x128xi32>
    %cst_9 = arith.constant 0.000000e+00 : f32
    %30 = vector.broadcast %cst_9 : f32 to vector<1x8x128xf32>
    %31 = arith.select %29, %17, %30 : vector<1x8x128xi1>, vector<1x8x128xf32>
    %cst_10 = arith.constant dense<0.000000e+00> : vector<8x128xf32>
    %32 = vector.multi_reduction <add>, %31, %cst_10 [0] : vector<1x8x128xf32> to vector<8x128xf32>
    %c0_11 = arith.constant 0 : index
    %c0_12 = arith.constant 0 : index
    %c0_13 = arith.constant 0 : index
    %33 = vector.load %arg5[%c0_11, %c0_12, %c0_13] : memref<1x8x128xf32, #tpu.memory_space<vmem>>, vector<1x8x128xf32>
    %34 = vector.shape_cast %32 : vector<8x128xf32> to vector<1x8x128xf32>
    %35 = arith.addf %33, %34 : vector<1x8x128xf32>
    %c0_14 = arith.constant 0 : index
    %c0_15 = arith.constant 0 : index
    %c0_16 = arith.constant 0 : index
    %36 = vector.load %arg5[%c0_14, %c0_15, %c0_16] : memref<1x8x128xf32, #tpu.memory_space<vmem>>, vector<1x8x128xf32>
    tpu.vector_store %arg5[%c0_14, %c0_15, %c0_16], %35 {strides = array<i32>} : memref<1x8x128xf32, #tpu.memory_space<vmem>>, vector<1x8x128xf32>,
    return
  }
  func.func @transform_0(%arg0: i32, %arg1: i32, %arg2: memref<2xi32, #tpu.memory_space<smem>>) -> (i32, i32, i32) {
    %c0_i32 = arith.constant 0 : i32
    %c0_i32_0 = arith.constant 0 : i32
    return %arg0, %arg1, %c0_i32 : i32, i32, i32
  }
  func.func @transform_1(%arg0: i32, %arg1: i32, %arg2: memref<2xi32, #tpu.memory_space<smem>>) -> (i32, i32, i32) {
    %c0_i32 = arith.constant 0 : i32
    %c0_i32_0 = arith.constant 0 : i32
    return %arg0, %arg1, %c0_i32 : i32, i32, i32
  }
  func.func @transform_2(%arg0: i32, %arg1: i32, %arg2: memref<2xi32, #tpu.memory_space<smem>>) -> (i32, i32, i32) {
    %c0_i32 = arith.constant 0 : i32
    %c0_i32_0 = arith.constant 0 : i32
    %c0_i32_1 = arith.constant 0 : i32
    return %arg0, %c0_i32, %c0_i32_0 : i32, i32, i32
  }
}

</mosaic_0001>

<bundles_post_ra>
// kernel: tpu_custom_call.1
= control target key start
LH: loop header
LB: loop body
LE: loop exit
PB: predicated region body
PF: predicated region fallthrough
CT: control target
= control target key end

     0   :  { %s883_s0 = inlined_call_operand.hbm [shape: s32[2], index: 0, kind: input, shape index: {}]   ;;  %s884_s1 = inlined_call_operand.hbm [shape: f32[2,8,128], index: 1, kind: input, shape index: {}]   ;;  %s885_s2 = inlined_call_operand.hbm [shape: f32[2,8,128], index: 2, kind: input, shape index: {}]   ;;  %s886_s3 = inlined_call_operand.hbm [shape: f32[2,8,128], index: 3, kind: output, shape index: {}]  }
   0x1   :  { %s461_s14 = scalar_lea.hbm %s883_s0, 16 }
   0x2   :  { %p462_p0 = scmp.ne.s32.totalorder %s883_s0, %s461_s14  ;;  %p465_p1 = scmp.lt.u32.totalorder %s461_s14, %s883_s0 }
   0x4   :  { %p467_p2 = pnand %p465_p1, %p462_p0 }
   0x6   :  { %470 = shalt.err (!%p467_p2)  }
   0x7   :  { %s621_s19 = smov [#allocation3]  }
   0x8   :  { %9 = dma.hbm_to_smem %s883_s0, 16, %s621_s19, [#allocation2] }
   0x9   :  { %583 = dma.done.wait [#allocation2], 16 }
   0xa   :  { %584 = vsyncadd [#allocation2], 4294967280 }
   0xb   :  { %11 = sfence }
   0xc   :  { %12 = vsyncpa [#allocation5], 0 }
   0xd   :  { %14 = vsyncpa [#allocation5 + $0x1], 0 }
   0xe   :  { %15 = vsyncpa [#allocation8], 0 }
   0xf   :  { %17 = vsyncpa [#allocation8 + $0x1], 0 }
  0x10   :  { %18 = vsyncpa [#allocation6], 0 }
  0x11   :  { %20 = vsyncpa [#allocation6 + $0x1], 0  ;;  %s657_s22 = smov 0   ;;  %s659_s23 = smov 0  }
  0x12   :  { %s661_s24 = smov 0   ;;  %s663_s25 = smov 0  }
  0x13   :  { %s665_s26 = smov 0   ;;  %s667_s0 = smov 0  }
  0x14 LB: > { %s371_s27 = sadd.s32 4294967295, %s619_s0   ;;  %s372_s28 = sadd.s32 4294967294, %s619_s0   ;;  %s619_s0 = sphi %s667_s0, %s26_s0   ;;  %s615_s26 = sphi %s665_s26, %s906_s26   ;;  %s611_s25 = sphi %s663_s25, %s905_s25   ;;  %s607_s24 = sphi %s661_s24, %s904_s24   ;;  %s603_s23 = sphi %s659_s23, %s903_s23   ;;  %s599_s22 = sphi %s657_s22, %s902_s22  }
  0x15   : > { %s38_s29 = sadd.s32 1, %s615_s26  ;;  %s47_s30 = sadd.s32 1, %s607_s24 }
  0x16   : > { %p40_p3 = scmp.ge.s32.totalorder %s38_s29, 2  ;;  %p54_p4 = scmp.ne.s32.totalorder %s607_s24, %s603_s23 }
  0x17   : > { %p55_p5 = scmp.eq.s32.totalorder %s619_s0, 0  ;;  %p60_p6 = scmp.ne.s32.totalorder %s603_s23, %s599_s22 }
  0x18   : > { %s908_s29 = smov (%p40_p3, %s38_s29), 0  ;;  %p61_p8 = scmp.eq.s32.totalorder %s371_s27, 0 }
  0x19   : > { %p698_p7 = por %p55_p5, %p54_p4  ;;  %s42_s5 = ssub.s32 %s615_s26, %s908_s29 }
  0x1a   : > { %p112_p9 = scmp.eq.s32.totalorder %s371_s27, 1  ;;  %p45_p10 = scmp.eq.s32.totalorder %s42_s5, 0 }
  0x1b   : > { %p704_p11 = por %p61_p8, %p60_p6  ;;  %p118_p13 = scmp.eq.s32.totalorder %s372_s28, 1 }
  0x1c   : > { %p708_p12 = por %p112_p9, %p54_p4  ;;  %p405_p2 = scmp.lt.s32.totalorder %s619_s0, 2 }
  0x1d   : > { %s890_s6 = scalar_select %p704_p11, 1, 0 }
  0x1e   : > { %s891_s7 = scalar_select %p708_p12, 1, 0 }
  0x1f   : > { %s713_s8 = scalar_select %p45_p10, %s607_s24, %s47_s30  }
  0x20   : > { %p715_p0 = por %p118_p13, %p60_p6  ;;  %s722_s10 = sand.u32 1, %s607_s24  }
  0x21   : > { %s375_s11 = sshll.u32 %s722_s10, 3  ;;  %s376_s12 = sshll.u32 %s615_s26, 7 }
  0x22   : > { %s892_s9 = scalar_select %p715_p0, 1, 0 }
  0x23   : > { %s731_s15 = scalar_lea.hbm %s884_s1, %s376_s12  ;;  %s142_s16 = scalar_lea.vmem [#allocation4], %s375_s11 }
  0x24   : > { %s150_s17 = sshll.u32 %s142_s16, 4  ;;  %p739_p3 = pnand %p405_p2, %p698_p7  ;;  %s735_s17 = int_to_ptr.vmem [resolvable:$true] %s150_s17 }
  0x25   : > { %s139_s19 = scalar_lea.sflag [#allocation5], %s722_s10  ;;  %s471_s20 = scalar_lea.hbm %s731_s15, 128 }
  0x26   : > { %p472_p6 = scmp.ne.s32.totalorder %s731_s15, %s471_s20  ;;  %p473_p8 = pneg %p739_p3 }
  0x27   : > { %s476_s28 = scalar_lea.hbm %s884_s1, 256  ;;  %p477_p7 = scmp.lt.u32.totalorder %s731_s15, %s884_s1 }
  0x28   : > { %p474_p9 = pnand %p473_p8, %p472_p6  ;;  %p478_p13 = scmp.lt.u32.totalorder %s476_s28, %s471_s20 }
  0x29   : > { %p480_p1 = scmp.lt.u32.totalorder %s471_s20, %s731_s15 }
  0x2a   : > { %p475_p10 = pneg %p474_p9  ;;  %p479_p2 = por %p478_p13, %p477_p7 }
  0x2c   : > { %p481_p4 = por %p480_p1, %p479_p2 }
  0x2e   : > { %p482_p5 = pnand %p481_p4, %p475_p10 }
  0x30   : > { %485 = shalt.err (!%p482_p5)
}
  0x31   : > { %s486_s5 = scalar_lea.vmem %s735_s17, 128  ;;  %s622_s13 = smov [#allocation4]  }
  0x32   : > { %p487_p6 = scmp.ne.s32.totalorder %s735_s17, %s486_s5  ;;  %s491_s14 = sshll.u32 %s622_s13, 4  ;;  %s492_s14 = int_to_ptr.vmem [resolvable:$false] %s491_s14 }
  0x33   : > { %s493_s16 = scalar_lea.vmem %s492_s14, 256  ;;  %p494_p12 = scmp.lt.s32.totalorder %s735_s17, %s492_s14 }
  0x34   : > { %p489_p9 = pnand %p487_p6, %p473_p8  ;;  %p495_p7 = scmp.lt.s32.totalorder %s493_s16, %s486_s5 }
  0x36   : > { %p490_p0 = pneg %p489_p9  ;;  %p496_p13 = por %p495_p7, %p494_p12 }
  0x38   : > { %p497_p1 = pnand %p496_p13, %p490_p0 }
  0x3a   : > { %500 = shalt.err (!%p497_p1)
}
  0x3b   : > { %397 = dma.hbm_to_vmem [thread:$0]  (!%p739_p3), %s731_s15, 128, %s735_s17, %s139_s19  }
  0x3c   : > { %p894_p4 = scmp.lt.s32.totalorder %s619_s0, 3  ;;  %p895_p5 = scmp.ge.s32.totalorder %s619_s0, 1 }
  0x3d   : > { %s784_s28 = scalar_lea.hbm %s885_s2, %s376_s12  ;;  %s161_s30 = scalar_lea.vmem [#allocation7], %s375_s11 }
  0x3e   : > { %p775_p10 = pnand %p895_p5, %p894_p4  ;;  %s169_s4 = sshll.u32 %s161_s30, 4  ;;  %s170_s4 = int_to_ptr.vmem [resolvable:$true] %s169_s4 }
  0x3f   : > { %s158_s15 = scalar_lea.sflag [#allocation8], %s722_s10  ;;  %s501_s17 = scalar_lea.hbm %s784_s28, 128 }
  0x40   : > { %s896_s20 = scalar_select %p775_p10, 1, 0 }
  0x41   : > { %p502_p12 = scmp.ne.s32.totalorder %s784_s28, %s501_s17  ;;  %s506_s12 = scalar_lea.hbm %s885_s2, 256 }
  0x42   : > { %p507_p6 = scmp.lt.u32.totalorder %s784_s28, %s885_s2  ;;  %p508_p9 = scmp.lt.u32.totalorder %s506_s12, %s501_s17 }
  0x43   : > { %p504_p0 = pnand %p502_p12, %p473_p8  ;;  %p510_p13 = scmp.lt.u32.totalorder %s501_s17, %s784_s28 }
  0x44   : > { %p509_p7 = por %p508_p9, %p507_p6 }
  0x45   : > { %p505_p2 = pneg %p504_p0 }
  0x46   : > { %p511_p1 = por %p510_p13, %p509_p7 }
  0x48   : > { %p512_p4 = pnand %p511_p1, %p505_p2 }
  0x4a   : > { %515 = shalt.err (!%p512_p4)
}
  0x4b   : > { %s516_s10 = scalar_lea.vmem %s170_s4, 128  ;;  %s623_s11 = smov [#allocation7]  }
  0x4c   : > { %p517_p5 = scmp.ne.s32.totalorder %s170_s4, %s516_s10  ;;  %s521_s16 = sshll.u32 %s623_s11, 4  ;;  %s522_s16 = int_to_ptr.vmem [resolvable:$false] %s521_s16 }
  0x4d   : > { %s523_s21 = scalar_lea.vmem %s522_s16, 256  ;;  %p524_p11 = scmp.lt.s32.totalorder %s170_s4, %s522_s16 }
  0x4e   : > { %p519_p12 = pnand %p517_p5, %p473_p8  ;;  %p525_p10 = scmp.lt.s32.totalorder %s523_s21, %s516_s10 }
  0x50   : > { %p520_p0 = pneg %p519_p12  ;;  %p526_p6 = por %p525_p10, %p524_p11 }
  0x52   : > { %p527_p9 = pnand %p526_p6, %p520_p0 }
  0x54   : > { %530 = shalt.err (!%p527_p9)
}
  0x55   : > { %400 = dma.hbm_to_vmem [thread:$0]  (!%p739_p3), %s784_s28, 128, %s170_s4, %s158_s15  }
  0x56   : > { %p897_p2 = scmp.ne.s32.totalorder %s896_s20, 0 }
  0x57   : > { %s811_s27 = sand.u32 (!%p897_p2), 1, %s603_s23   ;;  %p898_p11 = scmp.ne.s32.totalorder (!%p897_p2), %s890_s6, 0 }
  0x58   : > { %178 = sbr.rel (%p897_p2) target bundleno = 139 (0x8b), region = 28  ;;  %s814_s30 = sshll.u32 (!%p897_p2), %s811_s27, 3 }
  0x59   : > { %s181_s17 = scalar_lea.sflag (!%p897_p2), [#allocation5], %s811_s27  ;;  %s184_s19 = scalar_lea.vmem (!%p897_p2), [#allocation4], %s814_s30 }
  0x5f   : > { %586 = dma.done.wait (%p898_p11), %s181_s17, 128  }
  0x60   : > { %588 = vsyncadd (%p898_p11), %s181_s17, 4294967168  ;;  %s190_s18 = scalar_lea.sflag [#allocation8], %s811_s27  ;;  %s193_s20 = scalar_lea.vmem [#allocation7], %s814_s30 }
  0x61   : > { %590 = dma.done.wait (%p898_p11), %s190_s18, 128  }
  0x62   : > { %592 = vsyncadd (%p898_p11), %s190_s18, 4294967168  ;;  %v224_v0 = vld [vmem:[%s184_s19] sm:$0xff]  ;;  %v241_v2 = vlaneseq  ;;  %s237_s28 = sld [smem:[#allocation3 + %s611_s25]]  ;;  %v225_v12 = vld [vmem:[%s193_s20] sm:$0xff]  ;;  %s385_s4 = sshll.u32 %s611_s25, 7 }
  0x63   : > { %457 = vlog2.f32 %v224_v0  ;;  %v229_v1 = vsub.f32 1.0, %v224_v0  ;;  %s218_s15 = scalar_lea.vmem [#allocation9], %s814_s30  ;;  %s834_s14 = scalar_lea.hbm %s886_s3, %s385_s4 }
  0x64   : > { %v242_v4 = vshrl.u32 %v241_v2, 7  ;;  %v244_v9 = vand.u32 127, %v241_v2  ;;  %s268_s5 = sshll.u32 %s218_s15, 4  ;;  %s255_s10 = scalar_lea.sflag [#allocation6], %s811_s27  ;;  %s836_s5 = int_to_ptr.vmem [resolvable:$true] %s268_s5 }
  0x65   : > { %459 = vlog2.f32 %v229_v1  ;;  %s531_s11 = scalar_lea.vmem %s836_s5, 128  ;;  %p899_p8 = scmp.ne.s32.totalorder %s891_s7, 0 }
  0x66   : > { %v245_v10 = vmul.u32 128, %v242_v4  ;;  %p532_p3 = scmp.ne.s32.totalorder %s836_s5, %s531_s11  ;;  %s624_s25 = smov [#allocation9]  }
  0x67   : > { %s535_s16 = sshll.u32 %s624_s25, 4  ;;  %s536_s16 = int_to_ptr.vmem [resolvable:$false] %s535_s16 }
  0x68   : > { %s383_s6 = sshll.u32 %s237_s28, 3  ;;  %v246_v14 = vadd.s32 %v245_v10, %v244_v9  ;;  %p533_p10 = pnand %p532_p3, %p899_p8 }
  0x69   : > { %v247_v16 = vstv %s383_s6  ;;  %s537_s21 = scalar_lea.vmem %s536_s16, 256  ;;  %p538_p13 = scmp.lt.s32.totalorder %s836_s5, %s536_s16 }
  0x6a   : > { %vm248_vm0 = vcmp.lt.s32.totalorder %v246_v14, %v247_v16  ;;  %p534_p7 = pneg %p533_p10  ;;  %p539_p1 = scmp.lt.s32.totalorder %s537_s21, %s531_s11 }
  0x6c   : > { %p540_p4 = por %p539_p1, %p538_p13 }
  0x6d   : > { %v458_v3 = vpop.eup %457 }
  0x6e   : > { %v227_v5 = vmul.f32 0.6931472, %v458_v3  ;;  %p541_p5 = pnand %p540_p4, %p534_p7 }
  0x6f   : > { %v460_v6 = vpop.eup %459 }
  0x70   : > { %v228_v7 = vmax.f32 %v227_v5, -100.0  ;;  %v231_v8 = vmul.f32 0.6931472, %v460_v6 }
  0x72   : > { %v232_v11 = vmax.f32 %v231_v8, -100.0 }
  0x74   : > { %v233_v13 = vsub.f32 %v228_v7, %v232_v11 }
  0x76   : > { %v234_v15 = vmul.f32 %v233_v13, %v225_v12 }
  0x78   : > { %v235_v17 = vadd.f32 %v234_v15, %v232_v11 }
  0x7a   : > { %v236_v18 = vsub.f32 0.0, %v235_v17 }
  0x7c   : > { %v249_v19 = vsel %vm248_vm0, %v236_v18, 0.0 }
  0x7d   : > { %253 = vst [vmem:[%s218_s15] sm:$0xff] %v249_v19 }
  0x7e   : > { %544 = shalt.err (!%p541_p5)
}
  0x7f   : > { %s545_s27 = scalar_lea.hbm %s834_s14, 128  ;;  %s549_s19 = scalar_lea.hbm %s886_s3, 256 }
  0x80   : > { %p546_p12 = scmp.ne.s32.totalorder %s834_s14, %s545_s27  ;;  %p550_p9 = scmp.lt.u32.totalorder %s834_s14, %s886_s3 }
  0x81   : > { %p551_p2 = scmp.lt.u32.totalorder %s549_s19, %s545_s27  ;;  %p553_p3 = scmp.lt.u32.totalorder %s545_s27, %s834_s14 }
  0x82   : > { %p547_p0 = pnand %p546_p12, %p899_p8 }
  0x83   : > { %p552_p11 = por %p551_p2, %p550_p9 }
  0x84   : > { %p548_p6 = pneg %p547_p0 }
  0x85   : > { %p554_p10 = por %p553_p3, %p552_p11 }
  0x87   : > { %p555_p7 = pnand %p554_p10, %p548_p6 }
  0x89   : > { %558 = shalt.err (!%p555_p7)
}
  0x8a   : > { %392 = dma.vmem_to_hbm [thread:$0]  (%p899_p8), %s836_s5, 128, %s834_s14, %s255_s10  }
  0x8b PF: > { %s280_s28 = sand.u32 1, %s599_s22   ;;  %p900_p13 = scmp.ne.s32.totalorder %s892_s9, 0 }
  0x8c   : > { %p901_p1 = scmp.ge.s32.totalorder %s619_s0, 2  ;;  %s281_s6 = scalar_lea.sflag [#allocation6], %s280_s28 }
  0x8e   : > { %p402_p4 = pnand %p901_p1, %p900_p13 }
  0x90   : > { %594 = dma.done.wait (!%p402_p4), %s281_s6, 128  }
  0x91   : > { %596 = vsyncadd (!%p402_p4), %s281_s6, 4294967168  ;;  %s26_s0 = sadd.s32 1, %s619_s0   ;;  %s902_s22 = smov %s603_s23 }
  0x92   : > { %p23_p5 = scmp.ge.s32.totalorder %s26_s0, 4   ;;  %s903_s23 = smov %s607_s24 }
  0x93   : > { %s904_s24 = smov %s713_s8  ;;  %s905_s25 = smov %s615_s26 }
  0x94   : > { %s906_s26 = smov %s908_s29  ;;  %25 = sbr.rel (!%p23_p5) target bundleno = 20 (0x14), region = 90 }
  0x9b   :  { %286 = vsyncpa [#allocation5], 1 }
  0x9c   :  { %288 = vsyncpa [#allocation5 + $0x1], 1 }
  0x9d   :  { %289 = vsyncpa [#allocation8], 1 }
  0x9e   :  { %291 = vsyncpa [#allocation8 + $0x1], 1 }
  0x9f   :  { %292 = vsyncpa [#allocation6], 1 }
  0xa0   :  { %294 = vsyncpa [#allocation6 + $0x1], 1 }

</bundles_post_ra>
